<compile_context>
chip_gen: v7x
topology: tpu7x:2x2x1
jax: 0.10.0
libtpu: 0.0.40
codegen_flags: <defaults>
</compile_context>

<pallas_src>
import functools

import jax
import jax.numpy as jnp
from jax.experimental import pallas as pl
from jax.experimental.pallas import tpu as pltpu


# ---------------------------------------------------------------------------
# Wrapper-side data rearrangement (no FLOPs).
# ---------------------------------------------------------------------------
def circular_pad_nchw(x, pad):
    """Matches CircularPadding.forward (NCHW): zero-pad H, wrap-around pad W.

    The PyTorch module zero-pads all four sides and then overwrites the W pads with
    wrapped columns taken from the already-H-padded tensor, so the wrapped columns
    carry zero rows at top/bottom.  Zero-padding H first and then concatenating the
    wrapped columns reproduces that exactly (validated against the literal
    transcription `_circular_pad_reference` below via the end-to-end check).
    """
    if pad == 0:
        return x
    x = jnp.pad(x, ((0, 0), (0, 0), (pad, pad), (0, 0)))     # zero-pad H only
    left = x[:, :, :, -pad:]                                  # original last `pad` cols
    right = x[:, :, :, :pad]                                  # original first `pad` cols
    return jnp.concatenate([left, x, right], axis=3)          # wrap W


def _im2col_nchw(xp, kh, kw, sh, sw, oh, ow):
    """(N, Cin, Hp, Wp) -> (N, KH*KW*Cin, OH*OW), K ordered (ky, kx, ci)."""
    n, cin, _, _ = xp.shape
    cols = []
    for ky in range(kh):
        for kx in range(kw):
            patch = jax.lax.slice(
                xp,
                (0, 0, ky, kx),
                (n, cin, ky + (oh - 1) * sh + 1, kx + (ow - 1) * sw + 1),
                (1, 1, sh, sw))                               # (N, Cin, OH, OW)
            cols.append(patch.reshape(n, cin, oh * ow))
    return jnp.concatenate(cols, axis=1)                      # (N, K, OH*OW)


# ---------------------------------------------------------------------------
# Pallas kernel: one fused GEMM + bias + ReLU per (image, pixel-tile).
# ---------------------------------------------------------------------------
def _gemm_bias_relu_kernel(w_ref, bias_ref, p_ref, o_ref):
    # Single fused MXU matmul over K = KH*KW*Cin (bf16 operands, f32 accumulation).
    acc = jnp.dot(w_ref[...], p_ref[0],
                  preferred_element_type=jnp.float32)          # (Cout, T) f32
    # Folded BatchNorm bias + ReLU epilogue; lane-dense store.
    o_ref[0] = jnp.maximum(acc + bias_ref[...], 0.0).astype(o_ref.dtype)


# ---------------------------------------------------------------------------
# Tiling / VMEM-budget heuristics.
# ---------------------------------------------------------------------------
def _vmem_budget_bytes():
    """Per-generation VMEM budget: ~96 MiB on 128-MiB parts (v5e/v6e), ~48 MiB on 64-MiB v7x."""
    try:
        cap = int(pltpu.get_tpu_info().vmem_capacity_bytes)
    except Exception:
        cap = 64 * 1024 * 1024        # conservative (v7x-sized) fallback
    return min((cap * 3) // 4, 100 * 1024 * 1024)


def _pick_spatial_tile(ohw, k_dim, cout, budget_bytes):
    """Largest MXU-aligned divisor of OH*OW whose (double-buffered) tiles fit the budget."""
    def fits(t):
        need = (2 * k_dim * t * 2      # double-buffered bf16 patch tile
                + 2 * cout * t * 4     # double-buffered f32 output tile
                + cout * k_dim * 2     # resident folded weights (bf16)
                + cout * 4)            # resident bias
        return need + (4 << 20) <= budget_bytes   # headroom for compiler scratch
    for align in (256, 128):           # 256-wide MXU on v6e/v7x; 128 fallback (v5e / odd sizes)
        t = (ohw // align) * align
        while t >= align:
            if ohw % t == 0 and fits(t):
                return t
            t -= align
    # Pixel axis smaller than 128 or with no aligned divisor: one full-extent block.
    return ohw


# ---------------------------------------------------------------------------
# Forward pass.
# ---------------------------------------------------------------------------
@functools.partial(
    jax.jit,
    static_argnames=("stride", "padding", "eps", "compute_dtype", "out_dtype"))
def conv_block_forward(x_nchw, w_oihw, conv_b, gamma, beta, run_mean, run_var,
                       *, stride, padding, eps=1e-5,
                       compute_dtype=jnp.bfloat16, out_dtype=jnp.float32):
    """ConvBlock.forward. Input/output are NCHW (PyTorch convention)."""
    n, cin, h, w = x_nchw.shape
    cout, cin_w, kh, kw = w_oihw.shape
    assert cin == cin_w

    # Cast to the (bf16) compute dtype BEFORE the pad / im2col wrapper passes so all
    # wrapper HBM traffic moves 2 B/elt.  Set compute_dtype=jnp.float32 for an
    # f32-operand path if tighter accuracy is required.
    x = x_nchw.astype(compute_dtype)
    xp = circular_pad_nchw(x, padding)
    hp, wp = xp.shape[2], xp.shape[3]
    oh = (hp - kh) // stride + 1
    ow = (wp - kw) // stride + 1
    ohw = oh * ow
    k = kh * kw * cin

    # im2col patches (wrapper glue): pixels on lanes, (ky, kx, ci) as contraction axis.
    # Note: K is left ragged (e.g. 36) rather than padded to the bf16 sublane tile;
    # padding it would inflate HBM traffic on this bandwidth-bound op.
    p = _im2col_nchw(xp, kh, kw, stride, stride, oh, ow)          # (N, K, OH*OW)

    # Fold conv bias + eval-mode BatchNorm: scale goes into the weights (f32 math,
    # then one cast), bias stays as the only epilogue operand.
    scale = gamma / jnp.sqrt(run_var + eps)                                   # (Cout,)
    bias2d = ((conv_b - run_mean) * scale + beta).astype(jnp.float32).reshape(cout, 1)
    w_flat = jnp.transpose(w_oihw, (0, 2, 3, 1)).reshape(cout, k).astype(jnp.float32)
    w_fold = (w_flat * scale[:, None]).astype(compute_dtype)                  # (Cout, K)

    budget = _vmem_budget_bytes()
    t = _pick_spatial_tile(ohw, k, cout, budget)
    grid = (n, ohw // t)

    out_flat = pl.pallas_call(
        _gemm_bias_relu_kernel,
        out_shape=jax.ShapeDtypeStruct((n, cout, ohw), out_dtype),
        grid=grid,
        in_specs=[
            pl.BlockSpec((cout, k), lambda b, s: (0, 0)),        # folded weights (resident)
            pl.BlockSpec((cout, 1), lambda b, s: (0, 0)),        # folded BN bias (resident)
            pl.BlockSpec((1, k, t), lambda b, s: (b, 0, s)),     # im2col tile (lane-dense)
        ],
        out_specs=pl.BlockSpec((1, cout, t), lambda b, s: (b, 0, s)),
        compiler_params=pltpu.CompilerParams(
            dimension_semantics=("parallel", "parallel"),
            vmem_limit_bytes=budget),
    )(w_fold, bias2d, p)

    # (N, Cout, OH*OW) is NCHW with spatial flattened -> reshape only, no transpose.
    return out_flat.reshape(n, cout, oh, ow)


# ---------------------------------------------------------------------------
# Pure-JAX f32 reference (independent, literal transcription of the PyTorch module).
# ---------------------------------------------------------------------------
def _circular_pad_reference(x, pad):
    """Literal transcription of CircularPadding.forward (independent of the kernel path)."""
    if pad == 0:
        return x
    x = jnp.pad(x, ((0, 0), (0, 0), (pad, pad), (pad, pad)))
    x = x.at[:, :, :, 0:pad].set(x[:, :, :, -2 * pad:-pad])
    x = x.at[:, :, :, -pad:].set(x[:, :, :, pad:2 * pad])
    return x


def _reference_forward(x_nchw, w_oihw, conv_b, gamma, beta, run_mean, run_var,
                       *, stride, padding, eps=1e-5):
    xp = _circular_pad_reference(x_nchw.astype(jnp.float32), padding)
    y = jax.lax.conv_general_dilated(
        xp, w_oihw.astype(jnp.float32), window_strides=(stride, stride),
        padding="VALID", dimension_numbers=("NCHW", "OIHW", "NCHW"))
    y = y + conv_b.reshape(1, -1, 1, 1)
    y = (y - run_mean.reshape(1, -1, 1, 1)) / jnp.sqrt(run_var.reshape(1, -1, 1, 1) + eps)
    y = y * gamma.reshape(1, -1, 1, 1) + beta.reshape(1, -1, 1, 1)
    return jnp.maximum(y, 0.0)


if __name__ == "__main__":
    # Small shapes consistent with ConvBlock(in=4, out=8, kernel=3, stride=1, pad=1).
    N, CIN, H, W = 2, 4, 16, 16
    COUT, K, STRIDE, PAD = 8, 3, 1, 1

    key = jax.random.PRNGKey(0)
    kx, kw_, kb, kg, kbt, km, kv = jax.random.split(key, 7)

    x = jax.random.normal(kx, (N, CIN, H, W), jnp.float32)

    # Deterministic synthetic parameters (PyTorch-like uniform fan-in init for conv).
    fan_in = CIN * K * K
    bound = 1.0 / (fan_in ** 0.5)
    w_conv = jax.random.uniform(kw_, (COUT, CIN, K, K), jnp.float32, -bound, bound)
    b_conv = jax.random.uniform(kb, (COUT,), jnp.float32, -bound, bound)
    gamma = jax.random.uniform(kg, (COUT,), jnp.float32, 0.5, 1.5)
    beta = jax.random.normal(kbt, (COUT,), jnp.float32) * 0.1
    run_mean = jax.random.normal(km, (COUT,), jnp.float32) * 0.1
    run_var = jax.random.uniform(kv, (COUT,), jnp.float32, 0.5, 1.5)

    out = conv_block_forward(x, w_conv, b_conv, gamma, beta, run_mean, run_var,
                             stride=STRIDE, padding=PAD)
    out = jax.block_until_ready(out)

    ref = _reference_forward(x, w_conv, b_conv, gamma, beta, run_mean, run_var,
                             stride=STRIDE, padding=PAD)
    assert out.shape == (N, COUT, H, W), out.shape
    # bf16 operands with f32 accumulation -> tolerance loosened vs pure-f32 reference.
    assert jnp.allclose(out, ref, atol=5e-2, rtol=5e-2), (
        "mismatch vs reference, max abs diff = %f" % float(jnp.max(jnp.abs(out - ref))))

    print("KERNEL_OK")
</pallas_src>

<mosaic_0001>
module attributes {stable_mosaic.version = 11 : i64} {
  func.func @_gemm_bias_relu_kernel(%arg0: i32, %arg1: i32, %arg2: memref<8x36xbf16, #tpu.memory_space<vmem>>, %arg3: memref<8x1xf32, #tpu.memory_space<vmem>>, %arg4: memref<1x36x256xbf16, #tpu.memory_space<vmem>>, %arg5: memref<1x8x256xf32, #tpu.memory_space<vmem>>) attributes {dimension_semantics = [#tpu.dimension_semantics<parallel>, #tpu.dimension_semantics<parallel>], iteration_bounds = array<i64: 2, 1>, scalar_prefetch = 0 : i64, scratch_operands = 0 : i64, tpu.core_type = #tpu.core_type<tc>, window_params = [{pipeline_mode = #tpu.pipeline_mode<synchronous>, transform_indices = @transform_0, window_bounds = array<i64: 8, 36>}, {pipeline_mode = #tpu.pipeline_mode<synchronous>, transform_indices = @transform_1, window_bounds = array<i64: 8, 1>}, {transform_indices = @transform_2, window_bounds = array<i64: 1, 36, 256>}, {transform_indices = @transform_3, window_bounds = array<i64: 1, 8, 256>}]} {
    %c0 = arith.constant 0 : index
    %c0_0 = arith.constant 0 : index
    %0 = vector.load %arg2[%c0, %c0_0] : memref<8x36xbf16, #tpu.memory_space<vmem>>, vector<8x36xbf16>
    %c0_1 = arith.constant 0 : index
    %c0_2 = arith.constant 0 : index
    %c0_3 = arith.constant 0 : index
    %1 = vector.load %arg4[%c0_1, %c0_2, %c0_3] : memref<1x36x256xbf16, #tpu.memory_space<vmem>>, vector<1x36x256xbf16>
    %2 = vector.shape_cast %1 : vector<1x36x256xbf16> to vector<36x256xbf16>
    %cst = arith.constant dense<0.000000e+00> : vector<8x256xf32>
    %3 = tpu.matmul %0, %2, %cst {dimension_numbers = #tpu.dot_dimension_numbers<[1], [0], [0], [1], [0, 0, 1, 1], [], []>} : vector<8x36xbf16>, vector<36x256xbf16>, vector<8x256xf32> -> vector<8x256xf32>
    %c0_4 = arith.constant 0 : index
    %c0_5 = arith.constant 0 : index
    %4 = vector.load %arg3[%c0_4, %c0_5] : memref<8x1xf32, #tpu.memory_space<vmem>>, vector<8x1xf32>
    %5 = vector.broadcast %4 : vector<8x1xf32> to vector<8x256xf32>
    %6 = arith.addf %3, %5 : vector<8x256xf32>
    %cst_6 = arith.constant 0.000000e+00 : f32
    %7 = vector.broadcast %cst_6 : f32 to vector<8x256xf32>
    %8 = arith.maximumf %6, %7 : vector<8x256xf32>
    %c0_7 = arith.constant 0 : index
    %c0_8 = arith.constant 0 : index
    %c0_9 = arith.constant 0 : index
    %9 = vector.load %arg5[%c0_7, %c0_8, %c0_9] : memref<1x8x256xf32, #tpu.memory_space<vmem>>, vector<1x8x256xf32>
    %10 = vector.shape_cast %9 : vector<1x8x256xf32> to vector<8x256xf32>
    %11 = vector.shape_cast %8 : vector<8x256xf32> to vector<1x8x256xf32>
    tpu.vector_store %arg5[%c0_7, %c0_8, %c0_9], %11 {strides = array<i32>} : memref<1x8x256xf32, #tpu.memory_space<vmem>>, vector<1x8x256xf32>,
    return
  }
  func.func @transform_0(%arg0: i32, %arg1: i32) -> (i32, i32) {
    %c0_i32 = arith.constant 0 : i32
    %c0_i32_0 = arith.constant 0 : i32
    %c0_i32_1 = arith.constant 0 : i32
    return %c0_i32, %c0_i32_0 : i32, i32
  }
  func.func @transform_1(%arg0: i32, %arg1: i32) -> (i32, i32) {
    %c0_i32 = arith.constant 0 : i32
    %c0_i32_0 = arith.constant 0 : i32
    %c0_i32_1 = arith.constant 0 : i32
    return %c0_i32, %c0_i32_0 : i32, i32
  }
  func.func @transform_2(%arg0: i32, %arg1: i32) -> (i32, i32, i32) {
    %c0_i32 = arith.constant 0 : i32
    %c0_i32_0 = arith.constant 0 : i32
    return %arg0, %c0_i32, %arg1 : i32, i32, i32
  }
  func.func @transform_3(%arg0: i32, %arg1: i32) -> (i32, i32, i32) {
    %c0_i32 = arith.constant 0 : i32
    %c0_i32_0 = arith.constant 0 : i32
    return %arg0, %c0_i32, %arg1 : i32, i32, i32
  }
}

</mosaic_0001>

<bundles_post_ra>
// kernel: conv_block_forward.1
= control target key start
LH: loop header
LB: loop body
LE: loop exit
PB: predicated region body
PF: predicated region fallthrough
CT: control target
= control target key end

     0   :  { %s490_s12 = smov 0   ;;  %s492_s13 = smov 0   ;;  %s529_s0 = inlined_call_operand.vmem [shape: bf16[8,36], index: 0, kind: input, shape index: {}]   ;;  %s530_s1 = inlined_call_operand.vmem [shape: f32[8,1], index: 1, kind: input, shape index: {}]   ;;  %s531_s2 = inlined_call_operand.vmem [shape: bf16[2,36,256], index: 2, kind: input, shape index: {}]   ;;  %s532_s3 = inlined_call_operand.vmem [shape: f32[2,8,256], index: 3, kind: output, shape index: {}]  }
   0x1   :  { %s494_s14 = smov 0  }
   0x2 LB: > { %s25_s15 = sadd.s32 1, %s463_s13  ;;  %p395_p0 = scmp.ge.s32.totalorder %s467_s14, 1  ;;  %s467_s14 = sphi %s494_s14, %s13_s14   ;;  %s463_s13 = sphi %s492_s13, %s534_s13   ;;  %s459_s12 = sphi %s490_s12, %s533_s12  }
   0x3   : > { %p27_p1 = scmp.ge.s32.totalorder %s25_s15, 2  ;;  %p158_p2 = scmp.lt.s32.totalorder %s467_s14, 3 }
   0x5   : > { %s536_s15 = smov (%p27_p1, %s25_s15), 0  ;;  %p159_p3 = pnand %p395_p0, %p158_p2 }
   0x6   : > { %p191_p4 = scmp.lt.s32.totalorder (!%p159_p3), %s459_s12, 1  ;;  %v469_v0 = vmov (!%p159_p3), 0   ;;  %v217_v1 = vld [vmem:[%s530_s1] sm:$0xff] (!%p159_p3)  ;;  %vm252_vm0 = vcmask (!%p159_p3), 1041408   ;;  %vm248_vm1 = vcmask (!%p159_p3), 293888  }
   0x7   : > { %162 = sbr.rel (%p159_p3) target bundleno = 249 (0xf9), region = 32  ;;  %291 = vmatprep.mubr.bf16.mxu0 (!%p159_p3), %v469_v0  ;;  %436 = vset.pattern.permute.xlu0 (!%p159_p3), %v469_v0  ;;  %v211_v10 = vld [vmem:[%s529_s0] sm:$0xf] (!%p159_p3) }
   0x8   : > { %220 = vperm.xlu0 (!%p159_p3), %436, %v217_v1  }
   0xe   : > { %s538_s12 = smov (!%p191_p4, %s459_s12), 1 }
   0xf   : > { %s410_s18 = smul.u32 40, %s538_s12  ;;  %s409_s24 = sshll.u32 %s538_s12, 4 }
  0x10   : > { %s208_s27 = scalar_lea.vmem %s532_s3, %s409_s24 }
  0x11   : > { %s198_s21 = scalar_lea.vmem %s531_s2, %s410_s18 }
  0x12   : > { %v437_v2 = vld [vmem:[%s198_s21 + $0x4] ss:$8 sps:$4 sm:$0xff]   ;;  %v439_v3 = vld [vmem:[%s198_s21] ss:$8 sps:$4 sm:$0xff]   ;;  %v440_v4 = vld [vmem:[%s198_s21 + $0x14] ss:$8 sps:$4 sm:$0xff]  }
  0x13   : > { %259 = vmatprep.subr.bf16.mxu0 %v437_v2  ;;  %v216_v5 = vld [vmem:[%s198_s21 + $0x20] sm:$0x33]  ;;  %v442_v6 = vld [vmem:[%s198_s21 + $0x10] ss:$8 sps:$4 sm:$0xff]  }
  0x14   : > { %260 = vmatpush1.bf16.msra.mxu0 %v439_v3  ;;  %v404_v7 = vcombine.high %v216_v5, %v216_v5  ;;  %v403_v8 = vcombine.low %v216_v5, %v216_v5 }
  0x15   : > { %261 = vmatprep.subr.bf16.mxu0 %v440_v4 }
  0x16   : > { %v254_v9 = vsel %vm252_vm0, %v403_v8, 0 }
  0x18   : > { %262 = vmatpush1.bf16.msra.mxu0 %v442_v6 }
  0x19   : > { %405 = vmatprep.subr.msk.bf16.mxu0 %vm252_vm0, %v404_v7 }
  0x1c   : > { %264 = vmatpush1.bf16.msra.mxu0 %v254_v9 }
  0x1f   : > { %406 = vmatmul.mubr.msk.bf16.vlgmr.msra.gmra.mrb[0].mxu0 %vm248_vm1, %v211_v10 }
  0x87   : > { %v221_v11 = vpop.permute.xlu0 %220 }
  0xf2   : > { %v293_v12 = vpop.f32.mrb[0].mxu0 }
  0xf3   : > { %v294_v13 = vadd.f32 %v293_v12, %v221_v11  ;;  %v295_v14 = vpop.f32.mrb[1].mxu0 }
  0xf4   : > { %v296_v15 = vadd.f32 %v295_v14, %v221_v11  ;;  %v297_v16 = vpop.f32.mrb[2].mxu0 }
  0xf5   : > { %v300_v17 = vmax.f32 %v294_v13, 0.0  ;;  %v298_v18 = vpop.f32.mrb[3].mxu0 }
  0xf6   : > { %v301_v19 = vmax.f32 %v296_v15, 0.0 }
  0xf7   : > { %302 = vst [vmem:[%s208_s27] sm:$0xff] %v300_v17 }
  0xf8   : > { %303 = vst [vmem:[%s208_s27 + $0x8] sm:$0xff] %v301_v19 }
  0xf9 PF: > { %s13_s14 = sadd.s32 1, %s467_s14   ;;  %s533_s12 = smov %s463_s13 }
  0xfa   : > { %p10_p5 = scmp.ge.s32.totalorder %s13_s14, 4   ;;  %s534_s13 = smov %s536_s15 }
  0xfc   :  { %12 = sbr.rel (!%p10_p5) target bundleno = 2 (0x2), region = 62 }

</bundles_post_ra>
